<compile_context>
chip_gen: v6e
topology: v6e:2x2x1
jax: 0.10.0
libtpu: 0.0.40
codegen_flags: <defaults>
</compile_context>

<pallas_src>
import jax
import jax.numpy as jnp
from jax.experimental import pallas as pl
from jax.experimental.pallas import tpu as pltpu

_LANE = 128  # lane width; (1, TB) output blocks must be multiples of this


def _linear_kernel(x_ref, w_ref, b_ref, o_ref):
    # x_ref: (TB, D) input dtype; w_ref: (1, D) same dtype; b_ref: (1,) f32 SMEM;
    # o_ref: (1, TB) f32 (lane-dense).
    y = jax.lax.dot_general(
        w_ref[...], x_ref[...],
        dimension_numbers=(((1,), (1,)), ((), ())),   # contract on D (trans_b)
        preferred_element_type=jnp.float32,           # f32 accumulation on MXU
    )                                                 # -> (1, TB)
    o_ref[...] = y + b_ref[0]                         # scalar bias from SMEM


def _vmem_limit_bytes():
    """Scoped-VMEM limit: half of physical VMEM (~64 MiB v5e/v6e, ~32 MiB v7x)."""
    try:
        phys = int(pltpu.get_tpu_info().vmem_capacity_bytes)
    except Exception:
        phys = 64 * 1024 * 1024  # conservative fallback = v7x per-TC physical VMEM
    return max(16 * 1024 * 1024, phys // 2)


def _choose_block_rows(B, D, itemsize, vmem_limit_bytes):
    """Largest legal row tile for this mem-bound op.

    Half of the scoped-VMEM limit is reserved for the two (double-buffered) x
    blocks; the rest covers the tiny lane-dense (1, TB) output buffers, the
    resident (1, D) weight row and compiler scratch.  The kernel has no (TB, D)
    f32 temporaries (MXU reads the native-dtype tile, accumulates in f32), so
    the x blocks are the only large VMEM consumers.
    """
    per_buffer = vmem_limit_bytes // 4
    tb = per_buffer // max(1, D * itemsize)
    tb = (tb // _LANE) * _LANE           # (1, TB) out block needs TB % 128 == 0
    if tb >= B:
        if B < 2 * _LANE:
            return B                     # single full-array block (always legal)
        # Whole batch would fit in one block: split in two so the "parallel"
        # batch axis can shard across both TensorCores on v7x.
        half = (B + 1) // 2
        tb = ((half + _LANE - 1) // _LANE) * _LANE
    return max(_LANE, tb)


def logistic_regression_forward(x, weight, bias):
    """Forward pass of LogisticRegression: x @ weight.T + bias.

    x:      (B, D) float32 or bfloat16
    weight: (1, D) float32  (PyTorch nn.Linear weight layout)
    bias:   (1,)   float32
    returns (B, 1) float32
    """
    B, D = x.shape
    w = weight.astype(x.dtype)                    # match MXU operand dtypes
    b = bias.reshape(1).astype(jnp.float32)       # scalar bias in SMEM

    vmem_limit = _vmem_limit_bytes()
    TB = _choose_block_rows(B, D, x.dtype.itemsize, vmem_limit)
    grid = (pl.cdiv(B, TB),)

    out = pl.pallas_call(
        _linear_kernel,
        out_shape=jax.ShapeDtypeStruct((1, B), jnp.float32),
        grid=grid,
        in_specs=[
            pl.BlockSpec((TB, D), lambda i: (i, 0)),            # x row tiles
            pl.BlockSpec((1, D), lambda i: (0, 0)),             # resident weight
            pl.BlockSpec(memory_space=pltpu.MemorySpace.SMEM),  # bias scalar
        ],
        out_specs=pl.BlockSpec((1, TB), lambda i: (0, i)),      # lane-dense store
        compiler_params=pltpu.CompilerParams(
            dimension_semantics=("parallel",),
            vmem_limit_bytes=vmem_limit,
        ),
    )(x, w, b)
    # (1, B) -> (B, 1): same row-major linear order, pure metadata reshape.
    return out.reshape(B, 1)


if __name__ == "__main__":
    key = jax.random.PRNGKey(0)
    kx, kw, kb, kx2 = jax.random.split(key, 4)

    D = 32
    bound = 1.0 / jnp.sqrt(jnp.float32(D))
    # nn.Linear-style init; values snapped to the bf16 grid so the correctness
    # check is insensitive to the MXU's bf16 handling of f32 operands.
    weight = jax.random.uniform(kw, (1, D), minval=-bound, maxval=bound,
                                dtype=jnp.float32)
    weight = weight.astype(jnp.bfloat16).astype(jnp.float32)
    bias = jax.random.uniform(kb, (1,), minval=-bound, maxval=bound,
                              dtype=jnp.float32)

    # Check 1: f32 input, small batch (single full-array block).
    B1 = 8
    x1 = jax.random.normal(kx, (B1, D), dtype=jnp.float32)
    x1 = x1.astype(jnp.bfloat16).astype(jnp.float32)
    out1 = jax.block_until_ready(logistic_regression_forward(x1, weight, bias))
    ref1 = x1 @ weight.T + bias
    assert out1.shape == (B1, 1)
    assert jnp.allclose(out1, ref1, atol=1e-5), "mismatch vs reference (f32)"

    # Check 2: bf16 input, multi-block grid with a ragged last block.
    B2 = 300
    x2 = jax.random.normal(kx2, (B2, D), dtype=jnp.bfloat16)
    out2 = jax.block_until_ready(logistic_regression_forward(x2, weight, bias))
    ref2 = x2.astype(jnp.float32) @ weight.T + bias
    assert out2.shape == (B2, 1)
    assert jnp.allclose(out2, ref2, atol=1e-4), "mismatch vs reference (bf16)"

    print("KERNEL_OK")
</pallas_src>

<mosaic_0001>
module attributes {stable_mosaic.version = 11 : i64} {
  func.func @_linear_kernel(%arg0: i32, %arg1: memref<8x32xf32, #tpu.memory_space<vmem>>, %arg2: memref<1x32xf32, #tpu.memory_space<vmem>>, %arg3: memref<1xf32, #tpu.memory_space<smem>>, %arg4: memref<1x8xf32, #tpu.memory_space<vmem>>) attributes {dimension_semantics = [#tpu.dimension_semantics<parallel>], iteration_bounds = array<i64: 1>, scalar_prefetch = 0 : i64, scratch_operands = 0 : i64, tpu.core_type = #tpu.core_type<tc>, window_params = [{transform_indices = @transform_0, window_bounds = array<i64: 8, 32>}, {pipeline_mode = #tpu.pipeline_mode<synchronous>, transform_indices = @transform_1, window_bounds = array<i64: 1, 32>}, {transform_indices = @transform_2, window_bounds = array<i64: 1>}, {transform_indices = @transform_3, window_bounds = array<i64: 1, 8>}]} {
    %c0 = arith.constant 0 : index
    %c0_0 = arith.constant 0 : index
    %0 = vector.load %arg2[%c0, %c0_0] : memref<1x32xf32, #tpu.memory_space<vmem>>, vector<1x32xf32>
    %c0_1 = arith.constant 0 : index
    %c0_2 = arith.constant 0 : index
    %1 = vector.load %arg1[%c0_1, %c0_2] : memref<8x32xf32, #tpu.memory_space<vmem>>, vector<8x32xf32>
    %cst = arith.constant dense<0.000000e+00> : vector<1x8xf32>
    %2 = tpu.matmul %0, %1, %cst {dimension_numbers = #tpu.dot_dimension_numbers<[1], [1], [0], [0], [0, 0, 1, 0], [], []>} : vector<1x32xf32>, vector<8x32xf32>, vector<1x8xf32> -> vector<1x8xf32>
    %c0_3 = arith.constant 0 : index
    %3 = memref.load %arg3[%c0_3] : memref<1xf32, #tpu.memory_space<smem>>
    %4 = vector.broadcast %3 : f32 to vector<1x8xf32>
    %5 = arith.addf %2, %4 : vector<1x8xf32>
    %c0_4 = arith.constant 0 : index
    %c0_5 = arith.constant 0 : index
    %6 = vector.load %arg4[%c0_4, %c0_5] : memref<1x8xf32, #tpu.memory_space<vmem>>, vector<1x8xf32>
    tpu.vector_store %arg4[%c0_4, %c0_5], %5 {strides = array<i32>} : memref<1x8xf32, #tpu.memory_space<vmem>>, vector<1x8xf32>,
    return
  }
  func.func @transform_0(%arg0: i32) -> (i32, i32) {
    %c0_i32 = arith.constant 0 : i32
    %c0_i32_0 = arith.constant 0 : i32
    return %arg0, %c0_i32 : i32, i32
  }
  func.func @transform_1(%arg0: i32) -> (i32, i32) {
    %c0_i32 = arith.constant 0 : i32
    %c0_i32_0 = arith.constant 0 : i32
    %c0_i32_1 = arith.constant 0 : i32
    return %c0_i32, %c0_i32_0 : i32, i32
  }
  func.func @transform_2(%arg0: i32) -> i32 {
    %c0_i32 = arith.constant 0 : i32
    %c0_i32_0 = arith.constant 0 : i32
    return %c0_i32 : i32
  }
  func.func @transform_3(%arg0: i32) -> (i32, i32) {
    %c0_i32 = arith.constant 0 : i32
    %c0_i32_0 = arith.constant 0 : i32
    return %c0_i32, %arg0 : i32, i32
  }
}

</mosaic_0001>

<bundles_post_ra>
// kernel: tpu_custom_call.1
= control target key start
LH: loop header
LB: loop body
LE: loop exit
PB: predicated region body
PF: predicated region fallthrough
CT: control target
= control target key end

     0   :  { %9 = vsyncpa [#allocation4], 0  ;;  %s219_s0 = inlined_call_operand.hbm [shape: f32[8,32], index: 0, kind: input, shape index: {}]   ;;  %s220_s1 = inlined_call_operand.vmem [shape: f32[1,32], index: 1, kind: input, shape index: {}]   ;;  %s221_s2 = inlined_call_operand.<no memory space> [shape: f32[1], index: 2, kind: input, shape index: {}]   ;;  %s222_s3 = inlined_call_operand.hbm [shape: f32[1,8], index: 3, kind: output, shape index: {}]  }
   0x1   :  { %10 = vsyncpa [#allocation5], 0  ;;  %s183_s12 = smov [#allocation3]  }
   0x2   :  { %s17_s13 = sshll.u32 %s183_s12, 4  ;;  %s18_s13 = int_to_ptr.vmem [resolvable:$true] %s17_s13 }
   0x3   :  { %s147_s14 = scalar_lea.vmem %s18_s13, 128  ;;  %p152_p1 = scmp.lt.s32.totalorder %s18_s13, %s18_s13 }
   0x4   :  { %p148_p0 = scmp.ne.s32.totalorder %s18_s13, %s147_s14  ;;  %p153_p2 = scmp.lt.s32.totalorder %s147_s14, %s147_s14 }
   0x6   :  { %p154_p3 = por %p153_p2, %p152_p1 }
   0x8   :  { %p155_p4 = pnand %p154_p3, %p148_p0 }
   0xa   :  { %158 = shalt.err (!%p155_p4)
}
   0xb   :  { %20 = dma.hbm_to_vmem [thread:$0]  %s219_s0, 128, %s18_s13, [#allocation4]  }
   0xc   :  { %179 = dma.done.wait [#allocation4], 128  }
   0xd   :  { %180 = vsyncadd [#allocation4], 4294967168  ;;  %v184_v0 = vmov 0.0   ;;  %vm185_vm0 = vmmov 0   ;;  %vm32_vm1 = vcmask 261120   ;;  %v29_v1 = vld [vmem:[#allocation3] sm:$0xff]  ;;  %v31_v3 = vstv %s221_s2 }
   0xe   :  { %130 = vmatprep.subr.mxu0 %v184_v0  ;;  %132 = vmatprep.mubr.msk.f32.mxu0 %vm185_vm0, %v184_v0  ;;  %v28_v2 = vld [vmem:[%s220_s1] sm:$0x1]  ;;  %s186_s21 = smov [#allocation6]   ;;  %vm109_vm2 = vcmask 57344  }
   0xf   :  { %131 = vmatpush3.xpose.msk.msra.mxu0 %vm32_vm1, %v29_v1  ;;  %s117_s0 = sshll.u32 %s186_s21, 4  ;;  %s118_s0 = int_to_ptr.vmem [resolvable:$true] %s117_s0 }
  0x10   :  { %s159_s22 = scalar_lea.vmem %s118_s0, 16  ;;  %s163_s23 = scalar_lea.vmem %s118_s0, 32 }
  0x11   :  { %p160_p5 = scmp.ne.s32.totalorder %s118_s0, %s159_s22  ;;  %p164_p6 = scmp.lt.s32.totalorder %s118_s0, %s118_s0 }
  0x12   :  { %133 = vmatmul.mubr.msk.f32.vlgmr.msra.gmra.mxu0 %vm32_vm1, %v28_v2  ;;  %p165_p7 = scmp.lt.s32.totalorder %s163_s23, %s159_s22 }
  0x14   :  { %p166_p8 = por %p165_p7, %p164_p6 }
  0x16   :  { %p167_p9 = pnand %p166_p8, %p160_p5 }
  0xd2   :  { %v105_v4 = vpop.f32.mrf.mxu0 }
  0xd3   :  { %v106_v5 = vadd.f32 %v105_v4, %v31_v3 }
  0xd4   :  { %v134_v6 = vpop.f32.mrf.mxu0 }
  0xd5   :  { %110 = vst.msk [vmem:[#allocation6] sm:$0x1] %vm109_vm2, %v106_v5 }
  0xd6   :  { %170 = shalt.err (!%p167_p9)
}
  0xd7   :  { %120 = dma.vmem_to_hbm [thread:$0]  %s118_s0, 16, %s222_s3, [#allocation5]  }
  0xd8   :  { %181 = dma.done.wait [#allocation5], 16  }
  0xd9   :  { %182 = vsyncadd [#allocation5], 4294967280 }
  0xda   :  { %124 = vsyncpa [#allocation4], 1 }
  0xdb   :  { %125 = vsyncpa [#allocation5], 1 }

</bundles_post_ra>
